<compile_context>
chip_gen: v6e
topology: v6e:2x2x1
jax: 0.10.0
libtpu: 0.0.40
codegen_flags: <defaults>
</compile_context>

<pallas_src>
import jax
import jax.numpy as jnp
from jax import lax
from jax.experimental import pallas as pl
from jax.experimental.pallas import tpu as pltpu


def critic_kernel(x_ref, w1_ref, b1_ref, w2_ref, b2_ref, w3_ref, b3_ref, o_ref):
    # fc1: [TB, S](bf16, cast in-kernel) @ [S, 256](bf16) -> fp32 MXU accumulate
    x_bf16 = x_ref[...].astype(jnp.bfloat16)
    h1 = jnp.dot(x_bf16, w1_ref[...], preferred_element_type=jnp.float32)
    h1 = jnp.maximum(h1 + b1_ref[...], 0.0).astype(jnp.bfloat16)   # ReLU, bf16 feed

    # fc2: [TB, 256](bf16) @ [256, 256](bf16) -> fp32 MXU accumulate
    h2 = jnp.dot(h1, w2_ref[...], preferred_element_type=jnp.float32)
    h2 = jnp.maximum(h2 + b2_ref[...], 0.0)                        # ReLU, fp32

    # fc3 (out_features = 1): single lane-dense M=1 MXU pass producing [1, TB]
    # directly (no XLU reduce, no sublane->lane relayout).
    q = lax.dot_general(w3_ref[...], h2,
                        dimension_numbers=(((1,), (1,)), ((), ())),
                        preferred_element_type=jnp.float32)        # [1, TB]

    # Lane-dense store: batch on lanes, one [1, TB] row per grid step.
    o_ref[...] = (q + b3_ref[...]).astype(o_ref.dtype)


def critic_forward(x, params, *, tb_max=2048, min_grid=1):
    """x: [B, state_dim] float32 -> [B, 1] float32.

    tb_max:   max batch tile (multiple of 128). 2048 fits comfortably in scoped
              VMEM on v5e/v6e/v7x with the 32 MiB limit set below.
    min_grid: minimum number of grid steps when the batch allows it. Keep 1 on
              v5e/v6e (single TensorCore); use 2 on v7x for large batches so
              the "parallel" batch axis shards across both TensorCores.
    """
    w1, b1, w2, b2, w3, b3 = params
    B, S = x.shape
    H = w1.shape[1]

    # Batch tile: multiple of 128 (lane-dense output), capped for VMEM, and
    # optionally split so there are >= min_grid grid steps (v7x megacore).
    b128 = pl.cdiv(B, 128) * 128
    tb = min(tb_max, b128)
    if min_grid > 1 and b128 >= min_grid * 128:
        tb = min(tb, pl.cdiv(pl.cdiv(b128, min_grid), 128) * 128)
    b_pad = pl.cdiv(B, tb) * tb
    num_tiles = b_pad // tb

    # Host-side zero padding of the ragged final tile (padded rows produce
    # garbage Q values that are sliced away below — keep the [:B] slice).
    if b_pad != B:
        x = jnp.pad(x, ((0, b_pad - B), (0, 0)))

    # Weights cast to bf16 once (tiny, DMA'd once into resident VMEM blocks).
    # x stays fp32 at the call boundary; the bf16 cast happens in-kernel.
    w1_bf16 = w1.astype(jnp.bfloat16)
    w2_bf16 = w2.astype(jnp.bfloat16)
    w3_row = w3.reshape(1, H).astype(jnp.float32)       # [1, 256] for M=1 MXU pass
    b3_arr = jnp.asarray(b3, jnp.float32).reshape(1, 1)

    resident = pl.Buffered(1)  # constant-index blocks: no need to double-buffer

    out = pl.pallas_call(
        critic_kernel,
        out_shape=jax.ShapeDtypeStruct((num_tiles, tb), jnp.float32),
        grid_spec=pltpu.PrefetchScalarGridSpec(
            num_scalar_prefetch=0,
            grid=(num_tiles,),
            in_specs=[
                pl.BlockSpec((tb, S), lambda i: (i, 0)),                           # x tile (pipelined)
                pl.BlockSpec((S, H), lambda i: (0, 0), pipeline_mode=resident),    # w1  (resident)
                pl.BlockSpec((1, H), lambda i: (0, 0), pipeline_mode=resident),    # b1  (resident)
                pl.BlockSpec((H, H), lambda i: (0, 0), pipeline_mode=resident),    # w2  (resident)
                pl.BlockSpec((1, H), lambda i: (0, 0), pipeline_mode=resident),    # b2  (resident)
                pl.BlockSpec((1, H), lambda i: (0, 0), pipeline_mode=resident),    # w3 row (resident)
                pl.BlockSpec((1, 1), lambda i: (0, 0), pipeline_mode=resident),    # b3  (resident)
            ],
            out_specs=pl.BlockSpec((1, tb), lambda i: (i, 0)),
        ),
        compiler_params=pltpu.CompilerParams(
            dimension_semantics=("parallel",),            # both TCs on v7x when num_tiles >= 2
            vmem_limit_bytes=32 * 1024 * 1024),           # headroom for big tiles (v5e default is 16 MiB)
    )(x, w1_bf16, b1, w2_bf16, b2, w3_row, b3_arr)

    # Undo the lane-dense layout: [num_tiles, tb] -> [B, 1]
    return out.reshape(-1)[:B].reshape(B, 1)


def init_critic_params(key, state_dim, hidden=256):
    """Deterministic init mimicking PyTorch nn.Linear default (U[-1/sqrt(in), 1/sqrt(in)]).
    Weights are stored as [in, out] (transpose of torch layout); biases as [1, out]."""
    ks = jax.random.split(key, 6)

    def linear(kw, kb, fan_in, fan_out):
        bound = 1.0 / jnp.sqrt(jnp.float32(fan_in))
        w = jax.random.uniform(kw, (fan_in, fan_out), jnp.float32, -bound, bound)
        b = jax.random.uniform(kb, (1, fan_out), jnp.float32, -bound, bound)
        return w, b

    w1, b1 = linear(ks[0], ks[1], state_dim, hidden)
    w2, b2 = linear(ks[2], ks[3], hidden, hidden)
    w3, b3 = linear(ks[4], ks[5], hidden, 1)
    return (w1, b1, w2, b2, w3, b3)


def critic_reference(x, params):
    w1, b1, w2, b2, w3, b3 = params
    h1 = jnp.maximum(x @ w1 + b1, 0.0)
    h2 = jnp.maximum(h1 @ w2 + b2, 0.0)
    return h2 @ w3 + b3


if __name__ == "__main__":
    key = jax.random.PRNGKey(0)
    k_x, k_p = jax.random.split(key)

    batch = 8
    state_dim = 16   # small synthetic observation dimension

    x = jax.random.normal(k_x, (batch, state_dim), dtype=jnp.float32)
    params = init_critic_params(k_p, state_dim)

    q = critic_forward(x, params)
    q = jax.block_until_ready(q)

    # sanity check vs. pure-JAX fp32 reference (tolerance loosened for the
    # bf16 matmul inputs; accumulation stays fp32)
    q_ref = critic_reference(x, params)
    assert q.shape == (batch, 1)
    assert jnp.allclose(q, q_ref, atol=5e-2, rtol=5e-2), (
        f"max abs diff = {float(jnp.max(jnp.abs(q - q_ref)))}")

    print("KERNEL_OK")
</pallas_src>

<mosaic_0001>
module attributes {stable_mosaic.version = 11 : i64} {
  func.func @critic_kernel(%arg0: i32, %arg1: memref<128x16xf32, #tpu.memory_space<vmem>>, %arg2: memref<16x256xbf16, #tpu.memory_space<vmem>>, %arg3: memref<1x256xf32, #tpu.memory_space<vmem>>, %arg4: memref<256x256xbf16, #tpu.memory_space<vmem>>, %arg5: memref<1x256xf32, #tpu.memory_space<vmem>>, %arg6: memref<1x256xf32, #tpu.memory_space<vmem>>, %arg7: memref<1x1xf32, #tpu.memory_space<vmem>>, %arg8: memref<1x128xf32, #tpu.memory_space<vmem>>) attributes {dimension_semantics = [#tpu.dimension_semantics<parallel>], iteration_bounds = array<i64: 1>, scalar_prefetch = 0 : i64, scratch_operands = 0 : i64, tpu.core_type = #tpu.core_type<tc>, window_params = [{transform_indices = @transform_0, window_bounds = array<i64: 128, 16>}, {pipeline_mode = #tpu.pipeline_mode<synchronous>, transform_indices = @transform_1, window_bounds = array<i64: 16, 256>}, {pipeline_mode = #tpu.pipeline_mode<synchronous>, transform_indices = @transform_2, window_bounds = array<i64: 1, 256>}, {pipeline_mode = #tpu.pipeline_mode<synchronous>, transform_indices = @transform_3, window_bounds = array<i64: 256, 256>}, {pipeline_mode = #tpu.pipeline_mode<synchronous>, transform_indices = @transform_4, window_bounds = array<i64: 1, 256>}, {pipeline_mode = #tpu.pipeline_mode<synchronous>, transform_indices = @transform_5, window_bounds = array<i64: 1, 256>}, {pipeline_mode = #tpu.pipeline_mode<synchronous>, transform_indices = @transform_6, window_bounds = array<i64: 1, 1>}, {transform_indices = @transform_7, window_bounds = array<i64: 1, 128>}]} {
    %c0 = arith.constant 0 : index
    %c0_0 = arith.constant 0 : index
    %0 = vector.load %arg1[%c0, %c0_0] : memref<128x16xf32, #tpu.memory_space<vmem>>, vector<128x16xf32>
    %1 = arith.truncf %0 : vector<128x16xf32> to vector<128x16xbf16>
    %c0_1 = arith.constant 0 : index
    %c0_2 = arith.constant 0 : index
    %2 = vector.load %arg2[%c0_1, %c0_2] : memref<16x256xbf16, #tpu.memory_space<vmem>>, vector<16x256xbf16>
    %cst = arith.constant dense<0.000000e+00> : vector<128x256xf32>
    %3 = tpu.matmul %1, %2, %cst {dimension_numbers = #tpu.dot_dimension_numbers<[1], [0], [0], [1], [0, 0, 1, 1], [], []>} : vector<128x16xbf16>, vector<16x256xbf16>, vector<128x256xf32> -> vector<128x256xf32>
    %c0_3 = arith.constant 0 : index
    %c0_4 = arith.constant 0 : index
    %4 = vector.load %arg3[%c0_3, %c0_4] : memref<1x256xf32, #tpu.memory_space<vmem>>, vector<1x256xf32>
    %5 = vector.broadcast %4 : vector<1x256xf32> to vector<128x256xf32>
    %6 = arith.addf %3, %5 : vector<128x256xf32>
    %cst_5 = arith.constant 0.000000e+00 : f32
    %7 = vector.broadcast %cst_5 : f32 to vector<128x256xf32>
    %8 = arith.maximumf %6, %7 : vector<128x256xf32>
    %9 = arith.truncf %8 : vector<128x256xf32> to vector<128x256xbf16>
    %c0_6 = arith.constant 0 : index
    %c0_7 = arith.constant 0 : index
    %10 = vector.load %arg4[%c0_6, %c0_7] : memref<256x256xbf16, #tpu.memory_space<vmem>>, vector<256x256xbf16>
    %cst_8 = arith.constant dense<0.000000e+00> : vector<128x256xf32>
    %11 = tpu.matmul %9, %10, %cst_8 {dimension_numbers = #tpu.dot_dimension_numbers<[1], [0], [0], [1], [0, 0, 1, 1], [], []>} : vector<128x256xbf16>, vector<256x256xbf16>, vector<128x256xf32> -> vector<128x256xf32>
    %c0_9 = arith.constant 0 : index
    %c0_10 = arith.constant 0 : index
    %12 = vector.load %arg5[%c0_9, %c0_10] : memref<1x256xf32, #tpu.memory_space<vmem>>, vector<1x256xf32>
    %13 = vector.broadcast %12 : vector<1x256xf32> to vector<128x256xf32>
    %14 = arith.addf %11, %13 : vector<128x256xf32>
    %cst_11 = arith.constant 0.000000e+00 : f32
    %15 = vector.broadcast %cst_11 : f32 to vector<128x256xf32>
    %16 = arith.maximumf %14, %15 : vector<128x256xf32>
    %c0_12 = arith.constant 0 : index
    %c0_13 = arith.constant 0 : index
    %17 = vector.load %arg6[%c0_12, %c0_13] : memref<1x256xf32, #tpu.memory_space<vmem>>, vector<1x256xf32>
    %cst_14 = arith.constant dense<0.000000e+00> : vector<1x128xf32>
    %18 = tpu.matmul %17, %16, %cst_14 {dimension_numbers = #tpu.dot_dimension_numbers<[1], [1], [0], [0], [0, 0, 1, 0], [], []>} : vector<1x256xf32>, vector<128x256xf32>, vector<1x128xf32> -> vector<1x128xf32>
    %c0_15 = arith.constant 0 : index
    %c0_16 = arith.constant 0 : index
    %19 = vector.load %arg7[%c0_15, %c0_16] : memref<1x1xf32, #tpu.memory_space<vmem>>, vector<1x1xf32>
    %20 = vector.broadcast %19 : vector<1x1xf32> to vector<1x128xf32>
    %21 = arith.addf %18, %20 : vector<1x128xf32>
    %c0_17 = arith.constant 0 : index
    %c0_18 = arith.constant 0 : index
    %22 = vector.load %arg8[%c0_17, %c0_18] : memref<1x128xf32, #tpu.memory_space<vmem>>, vector<1x128xf32>
    tpu.vector_store %arg8[%c0_17, %c0_18], %21 {strides = array<i32>} : memref<1x128xf32, #tpu.memory_space<vmem>>, vector<1x128xf32>,
    return
  }
  func.func @transform_0(%arg0: i32) -> (i32, i32) {
    %c0_i32 = arith.constant 0 : i32
    %c0_i32_0 = arith.constant 0 : i32
    return %arg0, %c0_i32 : i32, i32
  }
  func.func @transform_1(%arg0: i32) -> (i32, i32) {
    %c0_i32 = arith.constant 0 : i32
    %c0_i32_0 = arith.constant 0 : i32
    %c0_i32_1 = arith.constant 0 : i32
    return %c0_i32, %c0_i32_0 : i32, i32
  }
  func.func @transform_2(%arg0: i32) -> (i32, i32) {
    %c0_i32 = arith.constant 0 : i32
    %c0_i32_0 = arith.constant 0 : i32
    %c0_i32_1 = arith.constant 0 : i32
    return %c0_i32, %c0_i32_0 : i32, i32
  }
  func.func @transform_3(%arg0: i32) -> (i32, i32) {
    %c0_i32 = arith.constant 0 : i32
    %c0_i32_0 = arith.constant 0 : i32
    %c0_i32_1 = arith.constant 0 : i32
    return %c0_i32, %c0_i32_0 : i32, i32
  }
  func.func @transform_4(%arg0: i32) -> (i32, i32) {
    %c0_i32 = arith.constant 0 : i32
    %c0_i32_0 = arith.constant 0 : i32
    %c0_i32_1 = arith.constant 0 : i32
    return %c0_i32, %c0_i32_0 : i32, i32
  }
  func.func @transform_5(%arg0: i32) -> (i32, i32) {
    %c0_i32 = arith.constant 0 : i32
    %c0_i32_0 = arith.constant 0 : i32
    %c0_i32_1 = arith.constant 0 : i32
    return %c0_i32, %c0_i32_0 : i32, i32
  }
  func.func @transform_6(%arg0: i32) -> (i32, i32) {
    %c0_i32 = arith.constant 0 : i32
    %c0_i32_0 = arith.constant 0 : i32
    %c0_i32_1 = arith.constant 0 : i32
    return %c0_i32, %c0_i32_0 : i32, i32
  }
  func.func @transform_7(%arg0: i32) -> (i32, i32) {
    %c0_i32 = arith.constant 0 : i32
    %c0_i32_0 = arith.constant 0 : i32
    return %arg0, %c0_i32 : i32, i32
  }
}

</mosaic_0001>

<bundles_post_ra>
// kernel: tpu_custom_call.1
= control target key start
LH: loop header
LB: loop body
LE: loop exit
PB: predicated region body
PF: predicated region fallthrough
CT: control target
= control target key end

     0   :  { %s1147_s0 = inlined_call_operand.vmem [shape: f32[128,16], index: 0, kind: input, shape index: {}]   ;;  %s1148_s1 = inlined_call_operand.vmem [shape: bf16[16,256], index: 1, kind: input, shape index: {}]   ;;  %s1149_s2 = inlined_call_operand.vmem [shape: f32[1,256], index: 2, kind: input, shape index: {}]   ;;  %s1150_s3 = inlined_call_operand.hbm [shape: bf16[256,256], index: 3, kind: input, shape index: {}]   ;;  %s1151_s4 = inlined_call_operand.vmem [shape: f32[1,256], index: 4, kind: input, shape index: {}]   ;;  %s1152_s5 = inlined_call_operand.vmem [shape: f32[1,256], index: 5, kind: input, shape index: {}]   ;;  %s1153_s6 = inlined_call_operand.<no memory space> [shape: f32[1,1], index: 6, kind: input, shape index: {}]   ;;  %s1154_s7 = inlined_call_operand.hbm [shape: f32[1,128], index: 7, kind: output, shape index: {}]  }
   0x1   :  { %v12_v0 = vstv %s1153_s6 }
   0x2   :  { %13 = vst [vmem:[#allocation2] sm:$0x1] %v12_v0 }
   0x3   :  { %14 = vsyncpa [#allocation4], 0 }
   0x4   :  { %15 = vsyncpa [#allocation5], 0  ;;  %s878_s26 = smov [#allocation3]  }
   0x5   :  { %s27_s27 = sshll.u32 %s878_s26, 4  ;;  %s28_s27 = int_to_ptr.vmem [resolvable:$true] %s27_s27 }
   0x6   :  { %s842_s28 = scalar_lea.vmem %s28_s27, 4096  ;;  %p847_p1 = scmp.lt.s32.totalorder %s28_s27, %s28_s27 }
   0x7   :  { %p843_p0 = scmp.ne.s32.totalorder %s28_s27, %s842_s28  ;;  %p848_p2 = scmp.lt.s32.totalorder %s842_s28, %s842_s28 }
   0x9   :  { %p849_p3 = por %p848_p2, %p847_p1 }
   0xb   :  { %p850_p4 = pnand %p849_p3, %p843_p0 }
   0xd   :  { %853 = shalt.err (!%p850_p4)
}
   0xe   :  { %s879_s29 = smov 128   ;;  %s880_s30 = smov 8  }
   0xf   :  { %33 = dma.hbm_to_vmem [thread:$0]  %s1150_s3, 4096, %s28_s27, [#allocation4], %s879_s29, %s879_s29, %s880_s30  }
  0x10   :  { %874 = dma.done.wait [#allocation4], 4096  }
  0x11   :  { %875 = vsyncadd [#allocation4], 4294963200  ;;  %v881_v1 = vmov 0   ;;  %v783_v2 = vld [vmem:[%s1148_s1 + $0x4] ss:$8 sps:$4 sm:$0xff]   ;;  %vm92_vm0 = vcmask 130048   ;;  %v72_v60 = vlaneseq }
  0x12   :  { %149 = vmatprep.mubr.bf16.mxu0 %v881_v1  ;;  %782 = vset.pattern.permute.xlu0 %v881_v1  ;;  %v785_v3 = vld [vmem:[%s1148_s1] ss:$8 sps:$4 sm:$0xff]   ;;  %v46_v7 = vld [vmem:[%s1147_s0 + $0x10] sm:$0xff]  ;;  %v47_v8 = vld [vmem:[%s1147_s0 + $0x18] sm:$0xff] }
  0x13   :  { %v44_v4 = vld [vmem:[%s1147_s0] sm:$0xff]  ;;  %v45_v5 = vld [vmem:[%s1147_s0 + $0x8] sm:$0xff]  ;;  %131 = vmatprep.subr.bf16.mxu0 %v783_v2  ;;  %v788_v10 = vld [vmem:[#allocation3 + $0x70] ss:$8 sps:$4 sm:$0xff]   ;;  %v61_v12 = vpack.c.bf16 %v47_v8, %v46_v7  ;;  %v73_v61 = vshrl.u32 %v72_v60, 7 }
  0x14   :  { %v60_v6 = vpack.c.bf16 %v45_v5, %v44_v4  ;;  %132 = vmatpush1.bf16.msra.mxu0 %v785_v3  ;;  %v786_v9 = vld [vmem:[#allocation3 + $0x74] ss:$8 sps:$4 sm:$0xff]   ;;  %v789_v11 = vld [vmem:[#allocation3 + $0x64] ss:$8 sps:$4 sm:$0xff]   ;;  %v791_v13 = vld [vmem:[#allocation3 + $0x60] ss:$8 sps:$4 sm:$0xff]  }
  0x15   :  { %482 = vmatprep.subr.bf16.mxu1 %v786_v9  ;;  %v792_v14 = vld [vmem:[#allocation3 + $0x54] ss:$8 sps:$4 sm:$0xff]   ;;  %v794_v16 = vld [vmem:[#allocation3 + $0x50] ss:$8 sps:$4 sm:$0xff]   ;;  %v49_v17 = vld [vmem:[%s1147_s0 + $0x28] sm:$0xff]  ;;  %v1000_v62 = vsub.s32 1, %v73_v61 }
  0x16   :  { %483 = vmatpush1.bf16.msra.mxu1 %v788_v10  ;;  %v48_v15 = vld [vmem:[%s1147_s0 + $0x20] sm:$0xff]  ;;  %v50_v22 = vld [vmem:[%s1147_s0 + $0x30] sm:$0xff]  ;;  %v51_v24 = vld [vmem:[%s1147_s0 + $0x38] sm:$0xff]  ;;  %v1002_v63 = vsub.s32 0, %v73_v61 }
  0x17   :  { %737 = vmatmul.mubr.msk.bf16.vlgmr.msra.gmra.mxu0 %vm92_vm0, %v60_v6  ;;  %484 = vmatprep.subr.bf16.mxu1 %v789_v11  ;;  %v795_v18 = vld [vmem:[#allocation3 + $0x44] ss:$8 sps:$4 sm:$0xff]   ;;  %v62_v19 = vpack.c.bf16 %v49_v17, %v48_v15  ;;  %v797_v20 = vld [vmem:[#allocation3 + $0x40] ss:$8 sps:$4 sm:$0xff]   ;;  %v798_v21 = vld [vmem:[#allocation3 + $0x34] ss:$8 sps:$4 sm:$0xff]   ;;  %v63_v26 = vpack.c.bf16 %v51_v24, %v50_v22 }
  0x18   :  { %159 = vmatprep.mubr.bf16.mxu0 %v881_v1  ;;  %v800_v23 = vld [vmem:[#allocation3 + $0x30] ss:$8 sps:$4 sm:$0xff]   ;;  %v801_v25 = vld [vmem:[#allocation3 + $0x24] ss:$8 sps:$4 sm:$0xff]   ;;  %v803_v27 = vld [vmem:[#allocation3 + $0x20] ss:$8 sps:$4 sm:$0xff]  }
  0x19   :  { %v804_v28 = vld [vmem:[#allocation3 + $0x14] ss:$8 sps:$4 sm:$0xff]   ;;  %v806_v29 = vld [vmem:[#allocation3 + $0x10] ss:$8 sps:$4 sm:$0xff]   ;;  %v53_v31 = vld [vmem:[%s1147_s0 + $0x48] sm:$0xff] }
  0x1a   :  { %485 = vmatpush1.bf16.msra.mxu1 %v791_v13  ;;  %v52_v30 = vld [vmem:[%s1147_s0 + $0x40] sm:$0xff]  ;;  %v812_v36 = vld [vmem:[#allocation3 + $0xf0] ss:$8 sps:$4 sm:$0xff]   ;;  %v57_v45 = vld [vmem:[%s1147_s0 + $0x68] sm:$0xff] }
  0x1b   :  { %486 = vmatprep.subr.bf16.mxu1 %v792_v14  ;;  %v807_v32 = vld [vmem:[#allocation3 + $0x4] ss:$8 sps:$4 sm:$0xff]   ;;  %v64_v33 = vpack.c.bf16 %v53_v31, %v52_v30  ;;  %v809_v34 = vld [vmem:[#allocation3] ss:$8 sps:$4 sm:$0xff]   ;;  %v810_v35 = vld [vmem:[#allocation3 + $0xf4] ss:$8 sps:$4 sm:$0xff]  }
  0x1c   :  { %v54_v37 = vld [vmem:[%s1147_s0 + $0x50] sm:$0xff]  ;;  %v55_v38 = vld [vmem:[%s1147_s0 + $0x58] sm:$0xff]  ;;  %v815_v41 = vld [vmem:[#allocation3 + $0xe0] ss:$8 sps:$4 sm:$0xff]  }
  0x1d   :  { %v813_v39 = vld [vmem:[#allocation3 + $0xe4] ss:$8 sps:$4 sm:$0xff]   ;;  %v65_v40 = vpack.c.bf16 %v55_v38, %v54_v37  ;;  %v816_v42 = vld [vmem:[#allocation3 + $0xd4] ss:$8 sps:$4 sm:$0xff]   ;;  %v818_v43 = vld [vmem:[#allocation3 + $0xd0] ss:$8 sps:$4 sm:$0xff]  }
  0x1e   :  { %487 = vmatpush1.bf16.msra.mxu1 %v794_v16  ;;  %v56_v44 = vld [vmem:[%s1147_s0 + $0x60] sm:$0xff]  ;;  %v824_v50 = vld [vmem:[#allocation3 + $0xb0] ss:$8 sps:$4 sm:$0xff]  }
  0x1f   :  { %738 = vmatmul.mubr.msk.bf16.gmra.mxu0 %vm92_vm0, %v61_v12  ;;  %488 = vmatprep.subr.bf16.mxu1 %v795_v18  ;;  %v819_v46 = vld [vmem:[#allocation3 + $0xc4] ss:$8 sps:$4 sm:$0xff]   ;;  %v66_v47 = vpack.c.bf16 %v57_v45, %v56_v44  ;;  %v821_v48 = vld [vmem:[#allocation3 + $0xc0] ss:$8 sps:$4 sm:$0xff]   ;;  %v822_v49 = vld [vmem:[#allocation3 + $0xb4] ss:$8 sps:$4 sm:$0xff]  }
  0x20   :  { %169 = vmatprep.mubr.bf16.mxu0 %v881_v1  ;;  %v58_v51 = vld [vmem:[%s1147_s0 + $0x70] sm:$0xff]  ;;  %v59_v52 = vld [vmem:[%s1147_s0 + $0x78] sm:$0xff]  ;;  %v827_v55 = vld [vmem:[#allocation3 + $0xa0] ss:$8 sps:$4 sm:$0xff]  }
  0x21   :  { %v67_v53 = vpack.c.bf16 %v59_v52, %v58_v51  ;;  %v825_v54 = vld [vmem:[#allocation3 + $0xa4] ss:$8 sps:$4 sm:$0xff]   ;;  %v828_v56 = vld [vmem:[#allocation3 + $0x94] ss:$8 sps:$4 sm:$0xff]   ;;  %v830_v57 = vld [vmem:[#allocation3 + $0x90] ss:$8 sps:$4 sm:$0xff]  }
  0x22   :  { %489 = vmatpush1.bf16.msra.mxu1 %v797_v20  ;;  %v831_v58 = vld [vmem:[#allocation3 + $0x84] ss:$8 sps:$4 sm:$0xff]   ;;  %v833_v59 = vld [vmem:[#allocation3 + $0x80] ss:$8 sps:$4 sm:$0xff]  }
  0x23   :  { %490 = vmatprep.subr.bf16.mxu1 %v798_v21  ;;  %v70_v0 = vld [vmem:[%s1149_s2] sm:$0x3] }
  0x24   :  { %v1008_v2 = vrot.slane %v70_v0, %v1000_v62  ;;  %v1011_v3 = vrot.slane %v70_v0, %v1002_v63 }
  0x26   :  { %491 = vmatpush1.bf16.msra.mxu1 %v800_v23 }
  0x27   :  { %739 = vmatmul.mubr.msk.bf16.gmra.mxu0 %vm92_vm0, %v62_v19  ;;  %492 = vmatprep.subr.bf16.mxu1 %v801_v25 }
  0x28   :  { %179 = vmatprep.mubr.bf16.mxu0 %v881_v1 }
  0x2a   :  { %493 = vmatpush1.bf16.msra.mxu1 %v803_v27 }
  0x2b   :  { %494 = vmatprep.subr.bf16.mxu1 %v804_v28 }
  0x2e   :  { %495 = vmatpush1.bf16.msra.mxu1 %v806_v29 }
  0x2f   :  { %740 = vmatmul.mubr.msk.bf16.gmra.mxu0 %vm92_vm0, %v63_v26  ;;  %496 = vmatprep.subr.bf16.mxu1 %v807_v32 }
  0x30   :  { %189 = vmatprep.mubr.bf16.mxu0 %v881_v1 }
  0x32   :  { %497 = vmatpush1.bf16.msra.mxu1 %v809_v34 }
  0x33   :  { %498 = vmatprep.subr.bf16.mxu1 %v810_v35 }
  0x36   :  { %499 = vmatpush2.bf16.msra.mxu1 %v812_v36 }
  0x37   :  { %741 = vmatmul.mubr.msk.bf16.gmra.mxu0 %vm92_vm0, %v64_v33  ;;  %500 = vmatprep.subr.bf16.mxu1 %v813_v39 }
  0x38   :  { %199 = vmatprep.mubr.bf16.mxu0 %v881_v1 }
  0x3a   :  { %501 = vmatpush2.bf16.msra.mxu1 %v815_v41 }
  0x3b   :  { %502 = vmatprep.subr.bf16.mxu1 %v816_v42 }
  0x3e   :  { %503 = vmatpush2.bf16.msra.mxu1 %v818_v43 }
  0x3f   :  { %742 = vmatmul.mubr.msk.bf16.gmra.mxu0 %vm92_vm0, %v65_v40  ;;  %504 = vmatprep.subr.bf16.mxu1 %v819_v46 }
  0x40   :  { %209 = vmatprep.mubr.bf16.mxu0 %v881_v1 }
  0x42   :  { %505 = vmatpush2.bf16.msra.mxu1 %v821_v48 }
  0x43   :  { %506 = vmatprep.subr.bf16.mxu1 %v822_v49 }
  0x46   :  { %507 = vmatpush2.bf16.msra.mxu1 %v824_v50 }
  0x47   :  { %743 = vmatmul.mubr.msk.bf16.gmra.mxu0 %vm92_vm0, %v66_v47  ;;  %508 = vmatprep.subr.bf16.mxu1 %v825_v54 }
  0x48   :  { %219 = vmatprep.mubr.bf16.mxu0 %v881_v1 }
  0x4a   :  { %509 = vmatpush2.bf16.msra.mxu1 %v827_v55 }
  0x4b   :  { %510 = vmatprep.subr.bf16.mxu1 %v828_v56 }
  0x4e   :  { %511 = vmatpush2.bf16.msra.mxu1 %v830_v57 }
  0x4f   :  { %744 = vmatmul.mubr.msk.bf16.gmra.mxu0 %vm92_vm0, %v67_v53  ;;  %512 = vmatprep.subr.bf16.mxu1 %v831_v58 }
  0x52   :  { %513 = vmatpush2.bf16.msra.mxu1 %v833_v59 }
  0xd7   :  { %v151_v1 = vpop.f32.mrf.mxu0 }
  0xd8   :  { %v152_v8 = vadd.f32 %v151_v1, %v1011_v3 }
  0xd9   :  { %v153_v4 = vpop.f32.mrf.mxu0 }
  0xda   :  { %v154_v6 = vadd.f32 %v153_v4, %v1008_v2  ;;  %v230_v15 = vmax.f32 %v152_v8, 0.0 }
  0xdb   :  { %v155_v5 = vpop.f32.mrf.mxu0 }
  0xdc   :  { %v156_v7 = vadd.f32 %v155_v5, %v1011_v3  ;;  %v231_v13 = vmax.f32 %v154_v6, 0.0 }
  0xdd   :  { %v157_v9 = vpop.f32.mrf.mxu0 }
  0xde   :  { %v158_v10 = vadd.f32 %v157_v9, %v1008_v2  ;;  %v232_v11 = vmax.f32 %v156_v7, 0.0 }
  0xdf   :  { %v161_v12 = vpop.f32.mrf.mxu0 }
  0xe0   :  { %v233_v14 = vmax.f32 %v158_v10, 0.0  ;;  %v262_v18 = vpack.c.bf16 %v232_v11, %v230_v15  ;;  %v162_v22 = vadd.f32 %v161_v12, %v1011_v3 }
  0xe1   :  { %v163_v16 = vpop.f32.mrf.mxu0 }
  0xe2   :  { %v263_v17 = vpack.c.bf16 %v233_v14, %v231_v13  ;;  %v164_v20 = vadd.f32 %v163_v16, %v1008_v2  ;;  %v234_v29 = vmax.f32 %v162_v22, 0.0 }
  0xe3   :  { %v165_v19 = vpop.f32.mrf.mxu0 }
  0xe4   :  { %v166_v21 = vadd.f32 %v165_v19, %v1011_v3  ;;  %514 = vmatprep.mubr.bf16.mxu1 %v263_v17  ;;  %v235_v27 = vmax.f32 %v164_v20, 0.0 }
  0xe5   :  { %v167_v23 = vpop.f32.mrf.mxu0  ;;  %515 = vmatmul.mubr.bf16.vlgmr.msra.gmra.mxu1 %v262_v18 }
  0xe6   :  { %v168_v24 = vadd.f32 %v167_v23, %v1008_v2  ;;  %v236_v25 = vmax.f32 %v166_v21, 0.0 }
  0xe7   :  { %v171_v26 = vpop.f32.mrf.mxu0 }
  0xe8   :  { %v237_v28 = vmax.f32 %v168_v24, 0.0  ;;  %v264_v32 = vpack.c.bf16 %v236_v25, %v234_v29  ;;  %v172_v36 = vadd.f32 %v171_v26, %v1011_v3 }
  0xe9   :  { %v173_v30 = vpop.f32.mrf.mxu0 }
  0xea   :  { %v265_v31 = vpack.c.bf16 %v237_v28, %v235_v27  ;;  %v174_v34 = vadd.f32 %v173_v30, %v1008_v2  ;;  %v238_v43 = vmax.f32 %v172_v36, 0.0 }
  0xeb   :  { %v175_v33 = vpop.f32.mrf.mxu0 }
  0xec   :  { %v176_v35 = vadd.f32 %v175_v33, %v1011_v3  ;;  %524 = vmatprep.mubr.bf16.mxu1 %v265_v31  ;;  %v239_v41 = vmax.f32 %v174_v34, 0.0 }
  0xed   :  { %v177_v37 = vpop.f32.mrf.mxu0  ;;  %525 = vmatmul.mubr.bf16.gmra.mxu1 %v264_v32 }
  0xee   :  { %v178_v38 = vadd.f32 %v177_v37, %v1008_v2  ;;  %v240_v39 = vmax.f32 %v176_v35, 0.0 }
  0xef   :  { %v181_v40 = vpop.f32.mrf.mxu0 }
  0xf0   :  { %v241_v42 = vmax.f32 %v178_v38, 0.0  ;;  %v266_v46 = vpack.c.bf16 %v240_v39, %v238_v43  ;;  %v182_v50 = vadd.f32 %v181_v40, %v1011_v3 }
  0xf1   :  { %v183_v44 = vpop.f32.mrf.mxu0 }
  0xf2   :  { %v267_v45 = vpack.c.bf16 %v241_v42, %v239_v41  ;;  %v184_v48 = vadd.f32 %v183_v44, %v1008_v2  ;;  %v242_v57 = vmax.f32 %v182_v50, 0.0 }
  0xf3   :  { %v185_v47 = vpop.f32.mrf.mxu0 }
  0xf4   :  { %v186_v49 = vadd.f32 %v185_v47, %v1011_v3  ;;  %534 = vmatprep.mubr.bf16.mxu1 %v267_v45  ;;  %v243_v55 = vmax.f32 %v184_v48, 0.0 }
  0xf5   :  { %v187_v51 = vpop.f32.mrf.mxu0  ;;  %535 = vmatmul.mubr.bf16.gmra.mxu1 %v266_v46 }
  0xf6   :  { %v188_v52 = vadd.f32 %v187_v51, %v1008_v2  ;;  %v244_v53 = vmax.f32 %v186_v49, 0.0 }
  0xf7   :  { %v191_v54 = vpop.f32.mrf.mxu0 }
  0xf8   :  { %v245_v56 = vmax.f32 %v188_v52, 0.0  ;;  %v268_v60 = vpack.c.bf16 %v244_v53, %v242_v57  ;;  %v192_v4 = vadd.f32 %v191_v54, %v1011_v3 }
  0xf9   :  { %v193_v58 = vpop.f32.mrf.mxu0 }
  0xfa   :  { %v269_v59 = vpack.c.bf16 %v245_v56, %v243_v55  ;;  %v194_v0 = vadd.f32 %v193_v58, %v1008_v2  ;;  %v246_v11 = vmax.f32 %v192_v4, 0.0  ;;  %v1048_v55 = vld [vmem:[%s1152_s5] sm:$0x3] }
  0xfb   :  { %v195_v61 = vpop.f32.mrf.mxu0 }
  0xfc   :  { %v196_v1 = vadd.f32 %v195_v61, %v1011_v3  ;;  %544 = vmatprep.mubr.bf16.mxu1 %v269_v59  ;;  %v247_v9 = vmax.f32 %v194_v0, 0.0 }
  0xfd   :  { %v197_v5 = vpop.f32.mrf.mxu0  ;;  %545 = vmatmul.mubr.bf16.gmra.mxu1 %v268_v60 }
  0xfe   :  { %v198_v6 = vadd.f32 %v197_v5, %v1008_v2  ;;  %v248_v7 = vmax.f32 %v196_v1, 0.0 }
  0xff   :  { %v201_v8 = vpop.f32.mrf.mxu0 }
 0x100   :  { %v249_v10 = vmax.f32 %v198_v6, 0.0  ;;  %v270_v14 = vpack.c.bf16 %v248_v7, %v246_v11  ;;  %v202_v18 = vadd.f32 %v201_v8, %v1011_v3 }
 0x101   :  { %v203_v12 = vpop.f32.mrf.mxu0 }
 0x102   :  { %v271_v13 = vpack.c.bf16 %v249_v10, %v247_v9  ;;  %v204_v16 = vadd.f32 %v203_v12, %v1008_v2  ;;  %v250_v25 = vmax.f32 %v202_v18, 0.0 }
 0x103   :  { %v205_v15 = vpop.f32.mrf.mxu0 }
 0x104   :  { %v206_v17 = vadd.f32 %v205_v15, %v1011_v3  ;;  %554 = vmatprep.mubr.bf16.mxu1 %v271_v13  ;;  %v251_v23 = vmax.f32 %v204_v16, 0.0 }
 0x105   :  { %v207_v19 = vpop.f32.mrf.mxu0  ;;  %555 = vmatmul.mubr.bf16.gmra.mxu1 %v270_v14 }
 0x106   :  { %v208_v20 = vadd.f32 %v207_v19, %v1008_v2  ;;  %v252_v21 = vmax.f32 %v206_v17, 0.0 }
 0x107   :  { %v211_v22 = vpop.f32.mrf.mxu0 }
 0x108   :  { %v253_v24 = vmax.f32 %v208_v20, 0.0  ;;  %v272_v28 = vpack.c.bf16 %v252_v21, %v250_v25  ;;  %v212_v32 = vadd.f32 %v211_v22, %v1011_v3  ;;  %v310_v25 = vld [vmem:[%s1151_s4] sm:$0x3]  ;;  %s882_s4 = smov [#allocation6]  }
 0x109   :  { %v213_v26 = vpop.f32.mrf.mxu0  ;;  %s726_s20 = sshll.u32 %s882_s4, 4  ;;  %s727_s20 = int_to_ptr.vmem [resolvable:$true] %s726_s20 }
 0x10a   :  { %v273_v27 = vpack.c.bf16 %v253_v24, %v251_v23  ;;  %v214_v30 = vadd.f32 %v213_v26, %v1008_v2  ;;  %v254_v39 = vmax.f32 %v212_v32, 0.0  ;;  %s854_s21 = scalar_lea.vmem %s727_s20, 16  ;;  %s858_s22 = scalar_lea.vmem %s727_s20, 32 }
 0x10b   :  { %v215_v29 = vpop.f32.mrf.mxu0  ;;  %p855_p5 = scmp.ne.s32.totalorder %s727_s20, %s854_s21  ;;  %p859_p6 = scmp.lt.s32.totalorder %s727_s20, %s727_s20 }
 0x10c   :  { %v216_v31 = vadd.f32 %v215_v29, %v1011_v3  ;;  %564 = vmatprep.mubr.bf16.mxu1 %v273_v27  ;;  %v255_v37 = vmax.f32 %v214_v30, 0.0  ;;  %v1088_v27 = vrot.slane %v310_v25, %v1002_v63  ;;  %v1091_v29 = vrot.slane %v310_v25, %v1000_v62  ;;  %p860_p7 = scmp.lt.s32.totalorder %s858_s22, %s854_s21 }
 0x10d   :  { %v217_v33 = vpop.f32.mrf.mxu0  ;;  %565 = vmatmul.mubr.bf16.gmra.mxu1 %v272_v28 }
 0x10e   :  { %v218_v34 = vadd.f32 %v217_v33, %v1008_v2  ;;  %v256_v35 = vmax.f32 %v216_v31, 0.0  ;;  %p861_p8 = por %p860_p7, %p859_p6 }
 0x10f   :  { %v221_v36 = vpop.f32.mrf.mxu0 }
 0x110   :  { %v257_v38 = vmax.f32 %v218_v34, 0.0  ;;  %v274_v42 = vpack.c.bf16 %v256_v35, %v254_v39  ;;  %v222_v46 = vadd.f32 %v221_v36, %v1011_v3  ;;  %p862_p9 = pnand %p861_p8, %p855_p5 }
 0x111   :  { %v223_v40 = vpop.f32.mrf.mxu0 }
 0x112   :  { %v275_v41 = vpack.c.bf16 %v257_v38, %v255_v37  ;;  %v224_v44 = vadd.f32 %v223_v40, %v1008_v2  ;;  %v258_v52 = vmax.f32 %v222_v46, 0.0 }
 0x113   :  { %v225_v43 = vpop.f32.mrf.mxu0 }
 0x114   :  { %v226_v45 = vadd.f32 %v225_v43, %v1011_v3  ;;  %574 = vmatprep.mubr.bf16.mxu1 %v275_v41  ;;  %v259_v50 = vmax.f32 %v224_v44, 0.0  ;;  %v646_v3 = vrot.slane %v1048_v55, %v1000_v62 }
 0x115   :  { %v227_v47 = vpop.f32.mrf.mxu0  ;;  %575 = vmatmul.mubr.bf16.gmra.mxu1 %v274_v42 }
 0x116   :  { %v228_v48 = vadd.f32 %v227_v47, %v1008_v2  ;;  %v260_v49 = vmax.f32 %v226_v45, 0.0  ;;  %713 = vmatprep.mubr.f32.mxu0 %v646_v3  ;;  %v628_v2 = vld [vmem:[#allocation2] sm:$0x1] }
 0x117   :  { %631 = vperm.xlu0 %782, %v628_v2  }
 0x118   :  { %v261_v51 = vmax.f32 %v228_v48, 0.0  ;;  %v276_v54 = vpack.c.bf16 %v260_v49, %v258_v52 }
 0x11a   :  { %v277_v53 = vpack.c.bf16 %v261_v51, %v259_v50 }
 0x11c   :  { %584 = vmatprep.mubr.bf16.mxu1 %v277_v53 }
 0x11d   :  { %585 = vmatmul.mubr.bf16.gmra.mxu1 %v276_v54 }
 0x1a5   :  { %v1050_v56 = vpop.f32.mrf.mxu1 }
 0x1a7   :  { %v1054_v57 = vpop.f32.mrf.mxu1 }
 0x1a9   :  { %v1056_v58 = vpop.f32.mrf.mxu1 }
 0x1ab   :  { %v1058_v59 = vpop.f32.mrf.mxu1 }
 0x1ad   :  { %v1060_v60 = vpop.f32.mrf.mxu1 }
 0x1af   :  { %v1062_v61 = vpop.f32.mrf.mxu1 }
 0x1b1   :  { %v1064_v0 = vpop.f32.mrf.mxu1 }
 0x1b3   :  { %v1066_v1 = vpop.f32.mrf.mxu1 }
 0x1b5   :  { %v1068_v4 = vpop.f32.mrf.mxu1 }
 0x1b7   :  { %v1070_v5 = vpop.f32.mrf.mxu1 }
 0x1b9   :  { %v1072_v6 = vpop.f32.mrf.mxu1 }
 0x1bb   :  { %v1074_v7 = vpop.f32.mrf.mxu1 }
 0x1bd   :  { %v1076_v8 = vpop.f32.mrf.mxu1 }
 0x1bf   :  { %v1078_v9 = vpop.f32.mrf.mxu1 }
 0x1c1   :  { %v1080_v10 = vpop.f32.mrf.mxu1 }
 0x1c3   :  { %v1082_v11 = vpop.f32.mrf.mxu1 }
 0x1c5   :  { %v556_v12 = vpop.f32.mrf.mxu1 }
 0x1c7   :  { %v558_v13 = vpop.f32.mrf.mxu1 }
 0x1c8   :  { %v559_v2 = vadd.f32 %v558_v13, %v1091_v29 }
 0x1c9   :  { %v560_v14 = vpop.f32.mrf.mxu1 }
 0x1ca   :  { %v561_v54 = vadd.f32 %v560_v14, %v1088_v27  ;;  %v549_v14 = vadd.f32 %v1078_v9, %v1091_v29  ;;  %v539_v9 = vadd.f32 %v1070_v5, %v1091_v29  ;;  %v529_v5 = vadd.f32 %v1062_v61, %v1091_v29 }
 0x1cb   :  { %v562_v15 = vpop.f32.mrf.mxu1  ;;  %v519_v61 = vadd.f32 %v1054_v57, %v1091_v29 }
 0x1cc   :  { %v563_v52 = vadd.f32 %v562_v15, %v1091_v29  ;;  %v551_v15 = vadd.f32 %v1080_v10, %v1088_v27  ;;  %v541_v10 = vadd.f32 %v1072_v6, %v1088_v27  ;;  %v531_v6 = vadd.f32 %v1064_v0, %v1088_v27 }
 0x1cd   :  { %v566_v16 = vpop.f32.mrf.mxu1  ;;  %v521_v0 = vadd.f32 %v1056_v58, %v1088_v27  ;;  %v632_v58 = vpop.permute.xlu0 %631 }
 0x1ce   :  { %v567_v50 = vadd.f32 %v566_v16, %v1088_v27  ;;  %v553_v16 = vadd.f32 %v1082_v11, %v1091_v29  ;;  %v543_v11 = vadd.f32 %v1074_v7, %v1091_v29  ;;  %v533_v7 = vadd.f32 %v1066_v1, %v1091_v29 }
 0x1cf   :  { %v568_v17 = vpop.f32.mrf.mxu1  ;;  %v523_v1 = vadd.f32 %v1058_v59, %v1091_v29 }
 0x1d0   :  { %v569_v48 = vadd.f32 %v568_v17, %v1091_v29  ;;  %v615_v3 = vmax.f32 %v567_v50, 0.0  ;;  %v557_v17 = vadd.f32 %v556_v12, %v1088_v27  ;;  %v610_v13 = vmax.f32 %v553_v16, 0.0 }
 0x1d1   :  { %v570_v18 = vpop.f32.mrf.mxu1  ;;  %v547_v12 = vadd.f32 %v1076_v8, %v1088_v27  ;;  %v606_v25 = vmax.f32 %v543_v11, 0.0  ;;  %v537_v8 = vadd.f32 %v1068_v4, %v1088_v27  ;;  %v527_v4 = vadd.f32 %v1060_v60, %v1088_v27 }
 0x1d2   :  { %v571_v46 = vadd.f32 %v570_v18, %v1088_v27  ;;  %v616_v53 = vmax.f32 %v569_v48, 0.0  ;;  %v614_v18 = vmax.f32 %v563_v52, 0.0  ;;  %v517_v60 = vadd.f32 %v1050_v56, %v1088_v27 }
 0x1d3   :  { %v572_v19 = vpop.f32.mrf.mxu1 }
 0x1d4   :  { %v573_v44 = vadd.f32 %v572_v19, %v1091_v29  ;;  %v617_v51 = vmax.f32 %v571_v46, 0.0  ;;  %v613_v19 = vmax.f32 %v561_v54, 0.0  ;;  %v595_v59 = vmax.f32 %v517_v60, 0.0 }
 0x1d5   :  { %v576_v20 = vpop.f32.mrf.mxu1 }
 0x1d6   :  { %v577_v42 = vadd.f32 %v576_v20, %v1088_v27  ;;  %v618_v49 = vmax.f32 %v573_v44, 0.0  ;;  %v612_v20 = vmax.f32 %v559_v2, 0.0 }
 0x1d7   :  { %v578_v21 = vpop.f32.mrf.mxu1 }
 0x1d8   :  { %v579_v40 = vadd.f32 %v578_v21, %v1091_v29  ;;  %v619_v47 = vmax.f32 %v577_v42, 0.0  ;;  %v611_v21 = vmax.f32 %v557_v17, 0.0 }
 0x1d9   :  { %v580_v22 = vpop.f32.mrf.mxu1 }
 0x1da   :  { %v581_v62 = vadd.f32 %v580_v22, %v1088_v27  ;;  %v620_v45 = vmax.f32 %v579_v40, 0.0  ;;  %v609_v22 = vmax.f32 %v551_v15, 0.0 }
 0x1db   :  { %v582_v23 = vpop.f32.mrf.mxu1 }
 0x1dc   :  { %v583_v37 = vadd.f32 %v582_v23, %v1091_v29  ;;  %v621_v43 = vmax.f32 %v581_v62, 0.0  ;;  %v608_v23 = vmax.f32 %v549_v14, 0.0  ;;  %v637_v62 = vrot.slane %v632_v58, %v1002_v63 }
 0x1dd   :  { %v586_v24 = vpop.f32.mrf.mxu1 }
 0x1de   :  { %v587_v35 = vadd.f32 %v586_v24, %v1088_v27  ;;  %v622_v41 = vmax.f32 %v583_v37, 0.0  ;;  %v607_v24 = vmax.f32 %v547_v12, 0.0  ;;  %v596_v37 = vmax.f32 %v519_v61, 0.0 }
 0x1df   :  { %v588_v26 = vpop.f32.mrf.mxu1 }
 0x1e0   :  { %v589_v32 = vadd.f32 %v588_v26, %v1091_v29  ;;  %v623_v39 = vmax.f32 %v587_v35, 0.0  ;;  %v605_v26 = vmax.f32 %v541_v10, 0.0  ;;  %v598_v35 = vmax.f32 %v523_v1, 0.0 }
 0x1e1   :  { %v590_v28 = vpop.f32.mrf.mxu1 }
 0x1e2   :  { %v591_v30 = vadd.f32 %v590_v28, %v1088_v27  ;;  %v624_v38 = vmax.f32 %v589_v32, 0.0  ;;  %v604_v28 = vmax.f32 %v539_v9, 0.0  ;;  %v601_v32 = vmax.f32 %v531_v6, 0.0 }
 0x1e3   :  { %v592_v31 = vpop.f32.mrf.mxu1 }
 0x1e4   :  { %v593_v33 = vadd.f32 %v592_v31, %v1091_v29  ;;  %v625_v36 = vmax.f32 %v591_v30, 0.0  ;;  %v603_v30 = vmax.f32 %v537_v8, 0.0  ;;  %v602_v31 = vmax.f32 %v533_v7, 0.0 }
 0x1e6   :  { %v626_v34 = vmax.f32 %v593_v33, 0.0  ;;  %v600_v33 = vmax.f32 %v529_v5, 0.0 }
 0x1e8   :  { %649 = vmatprep.subr.mxu0 %v626_v34  ;;  %v599_v34 = vmax.f32 %v527_v4, 0.0 }
 0x1e9   :  { %650 = vmatpush1.xpose.msra.mxu0 %v625_v36  ;;  %v597_v36 = vmax.f32 %v521_v0, 0.0 }
 0x1ea   :  { %651 = vmatprep.subr.mxu0 %v624_v38  ;;  %v642_v38 = vrot.slane %v1048_v55, %v1002_v63 }
 0x1ed   :  { %652 = vmatpush1.xpose.msra.mxu0 %v623_v39 }
 0x1ee   :  { %653 = vmatprep.subr.mxu0 %v622_v41 }
 0x1f1   :  { %654 = vmatpush1.xpose.msra.mxu0 %v621_v43 }
 0x1f2   :  { %655 = vmatprep.subr.mxu0 %v620_v45 }
 0x1f5   :  { %656 = vmatpush1.xpose.msra.mxu0 %v619_v47 }
 0x1f6   :  { %657 = vmatprep.subr.mxu0 %v618_v49 }
 0x1f9   :  { %658 = vmatpush1.xpose.msra.mxu0 %v617_v51 }
 0x1fa   :  { %659 = vmatprep.subr.mxu0 %v616_v53 }
 0x1fd   :  { %660 = vmatpush1.xpose.msra.mxu0 %v615_v3 }
 0x1fe   :  { %661 = vmatprep.subr.mxu0 %v614_v18 }
 0x201   :  { %662 = vmatpush1.xpose.msra.mxu0 %v613_v19 }
 0x202   :  { %663 = vmatprep.subr.mxu0 %v612_v20 }
 0x205   :  { %664 = vmatpush1.xpose.msra.mxu0 %v611_v21 }
 0x206   :  { %665 = vmatprep.subr.mxu0 %v610_v13 }
 0x209   :  { %666 = vmatpush1.xpose.msra.mxu0 %v609_v22 }
 0x20a   :  { %667 = vmatprep.subr.mxu0 %v608_v23 }
 0x20d   :  { %668 = vmatpush1.xpose.msra.mxu0 %v607_v24 }
 0x20e   :  { %669 = vmatprep.subr.mxu0 %v606_v25 }
 0x211   :  { %670 = vmatpush1.xpose.msra.mxu0 %v605_v26 }
 0x212   :  { %671 = vmatprep.subr.mxu0 %v604_v28 }
 0x215   :  { %672 = vmatpush1.xpose.msra.mxu0 %v603_v30 }
 0x216   :  { %673 = vmatprep.subr.mxu0 %v602_v31 }
 0x219   :  { %674 = vmatpush1.xpose.msra.mxu0 %v601_v32 }
 0x21a   :  { %675 = vmatprep.subr.mxu0 %v600_v33 }
 0x21d   :  { %676 = vmatpush1.xpose.msra.mxu0 %v599_v34 }
 0x21e   :  { %677 = vmatprep.subr.mxu0 %v598_v35 }
 0x221   :  { %678 = vmatpush1.xpose.msra.mxu0 %v597_v36 }
 0x222   :  { %679 = vmatprep.subr.mxu0 %v596_v37 }
 0x225   :  { %680 = vmatpush1.xpose.msra.mxu0 %v595_v59 }
 0x228   :  { %714 = vmatmul.mubr.f32.vlgmr.msra.gmra.mxu0 %v642_v38 }
 0x2e8   :  { %v715_v57 = vpop.f32.mrf.mxu0 }
 0x2e9   :  { %v716_v29 = vadd.f32 %v715_v57, %v637_v62 }
 0x2ea   :  { %v717_v39 = vpop.f32.mrf.mxu0 }
 0x2eb   :  { %719 = vst [vmem:[#allocation6] sm:$0x1] %v716_v29 }
 0x2ec   :  { %865 = shalt.err (!%p862_p9)
}
 0x2ed   :  { %729 = dma.vmem_to_hbm [thread:$0]  %s727_s20, 16, %s1154_s7, [#allocation5]  }
 0x2ee   :  { %876 = dma.done.wait [#allocation5], 16  }
 0x2ef   :  { %877 = vsyncadd [#allocation5], 4294967280 }
 0x2f0   :  { %733 = vsyncpa [#allocation4], 1 }
 0x2f1   :  { %734 = vsyncpa [#allocation5], 1 }

</bundles_post_ra>
